<compile_context>
chip_gen: v7x
topology: tpu7x:2x2x1
jax: 0.10.0
libtpu: 0.0.40
codegen_flags: <defaults>
</compile_context>

<pallas_src>
import math

import jax
import jax.numpy as jnp
import numpy as np
from jax.experimental import pallas as pl
from jax.experimental.pallas import tpu as pltpu

BN_EPS = 1e-5   # torch BatchNorm1d default
LANES = 128
TB_MAX = 1024   # batch-tile rows per grid step (bf16 x tile <= 1 MiB per buffer)


def _round_up(v, m):
    return ((v + m - 1) // m) * m


# ---------------------------------------------------------------------------
# fused kernel: conv(as matmul)+BN+SiLU -> Linear+SiLU -> Linear+ReLU
# ---------------------------------------------------------------------------
def _radius_fc_kernel(x_ref, wconv_ref, bnb_ref, w1_ref, b1_ref, w2_ref, b2_ref, o_ref):
    # CBS_1D: Conv1d(seq_len->1, k=3, p=1, bias=False) as im2col matmul,
    # eval-mode BN folded into (wconv, bnb), then SiLU.  x already bf16 (wrapper).
    x = x_ref[...]                                                          # (TB, C*L) bf16
    h = jnp.dot(x, wconv_ref[...], preferred_element_type=jnp.float32)      # (TB, L) f32
    h = h + bnb_ref[...]
    h = h * jax.nn.sigmoid(h)                                               # SiLU (f32)

    # nn.Linear(d_model, d_model) + SiLU
    h = jnp.dot(h.astype(jnp.bfloat16), w1_ref[...],
                preferred_element_type=jnp.float32) + b1_ref[...]
    h = h * jax.nn.sigmoid(h)

    # nn.Linear(d_model, 1) with the weight column replicated over 128 lanes
    # (lane-dense store), + ReLU; store bf16 to halve the writeback.
    r = jnp.dot(h.astype(jnp.bfloat16), w2_ref[...],
                preferred_element_type=jnp.float32) + b2_ref[...]
    o_ref[...] = jnp.maximum(r, 0.0).astype(o_ref.dtype)                    # (TB, 128)


def radius_fc_pallas(kparams, x, pred_len):
    B, C, L = x.shape
    # contiguous row-major flatten of (C, L); bf16 cast in the wrapper halves the
    # dominant HBM read on this memory-bound kernel.
    x2 = x.reshape(B, C * L).astype(jnp.bfloat16)

    TB = min(TB_MAX, _round_up(B, 8))          # sublane-aligned batch tile
    grid = (pl.cdiv(B, TB),)

    flops = 2 * B * (C * L * L + L * L + L * LANES)
    bytes_accessed = (B * C * L * 2 + B * LANES * 2                       # x in, r out (bf16)
                      + 2 * (C * L * L + L * L + L * LANES)               # bf16 weights
                      + 4 * (3 * L + LANES))                              # f32 biases

    out = pl.pallas_call(
        _radius_fc_kernel,
        out_shape=jax.ShapeDtypeStruct((B, LANES), jnp.bfloat16),
        grid=grid,
        in_specs=[
            pl.BlockSpec((TB, C * L), lambda i: (i, 0)),      # batch-tiled, double-buffered
            pl.BlockSpec((C * L, L), lambda i: (0, 0)),       # weights: constant index map
            pl.BlockSpec((1, L), lambda i: (0, 0)),           #   -> stay VMEM-resident
            pl.BlockSpec((L, L), lambda i: (0, 0)),
            pl.BlockSpec((1, L), lambda i: (0, 0)),
            pl.BlockSpec((L, LANES), lambda i: (0, 0)),
            pl.BlockSpec((1, LANES), lambda i: (0, 0)),
        ],
        out_specs=pl.BlockSpec((TB, LANES), lambda i: (i, 0)),
        compiler_params=pltpu.CompilerParams(dimension_semantics=("parallel",)),
        cost_estimate=pl.CostEstimate(flops=flops,
                                      transcendentals=2 * B * L,
                                      bytes_accessed=bytes_accessed),
    )(x2, kparams["wconv"], kparams["bn_bias"], kparams["w1"], kparams["b1"],
      kparams["w2"], kparams["b2"])

    r = out[:, :1].astype(jnp.float32)               # all 128 lanes hold the same value
    return jnp.broadcast_to(r[:, None, :], (B, pred_len, 1))   # torch .expand(-1, pred_len, -1)


# ---------------------------------------------------------------------------
# parameters: raw (module-shaped) params + kernel-ready folded params
# ---------------------------------------------------------------------------
def init_raw_params(key, seq_len, d_model):
    ks = jax.random.split(key, 5)
    return {
        "conv_w": jax.random.normal(ks[0], (seq_len, 3), jnp.float32) / np.sqrt(3 * seq_len),
        "bn_gamma": jnp.float32(1.2),
        "bn_beta": jnp.float32(-0.1),
        "bn_rm": jnp.float32(0.05),
        "bn_rv": jnp.float32(0.9),
        "w1": jax.random.normal(ks[1], (d_model, d_model), jnp.float32) / np.sqrt(d_model),
        "b1": 0.02 * jax.random.normal(ks[2], (d_model,), jnp.float32),
        "w2": jax.random.normal(ks[3], (d_model, 1), jnp.float32) / np.sqrt(d_model),
        "b2": 0.02 * jax.random.normal(ks[4], (1,), jnp.float32),
    }


def fold_params(raw, seq_len, d_model):
    """Build the banded im2col conv matrix, fold BN, cast matmul operands to bf16."""
    C, L = seq_len, d_model
    w = np.asarray(raw["conv_w"])                    # (C, 3)
    A = np.zeros((C, L, L), np.float32)              # A[c, l', l] = w[c, k] with l' = l + k - 1
    idx = np.arange(L)
    for k in range(3):
        lp = idx + (k - 1)
        valid = (lp >= 0) & (lp < L)
        A[:, lp[valid], idx[valid]] += w[:, k:k + 1]
    A = A.reshape(C * L, L)                          # 64 KiB at these dims (K-tile if it grows)

    bn_scale = float(raw["bn_gamma"]) / math.sqrt(float(raw["bn_rv"]) + BN_EPS)
    bn_shift = float(raw["bn_beta"]) - float(raw["bn_rm"]) * bn_scale

    return {
        "wconv": jnp.asarray(A * bn_scale, jnp.bfloat16),                   # (C*L, L)
        "bn_bias": jnp.full((1, L), bn_shift, jnp.float32),
        "w1": raw["w1"].astype(jnp.bfloat16),                               # (L, L)
        "b1": raw["b1"].reshape(1, L).astype(jnp.float32),
        "w2": jnp.tile(raw["w2"], (1, LANES)).astype(jnp.bfloat16),         # (L, 128) replicated col
        "b2": jnp.full((1, LANES), float(raw["b2"][0]), jnp.float32),
    }


# ---------------------------------------------------------------------------
# pure-JAX f32 reference (mirrors the torch module, eval-mode BN)
# ---------------------------------------------------------------------------
def radius_fc_reference(raw, x, pred_len):
    B, C, L = x.shape
    w = raw["conv_w"]                                                      # (C, 3)
    xp = jnp.pad(x, ((0, 0), (0, 0), (1, 1)))
    conv = (jnp.einsum("bcl,c->bl", xp[:, :, 0:L], w[:, 0])
            + jnp.einsum("bcl,c->bl", xp[:, :, 1:L + 1], w[:, 1])
            + jnp.einsum("bcl,c->bl", xp[:, :, 2:L + 2], w[:, 2]))
    h = (conv - raw["bn_rm"]) * (raw["bn_gamma"] / jnp.sqrt(raw["bn_rv"] + BN_EPS)) + raw["bn_beta"]
    h = h * jax.nn.sigmoid(h)
    h = h @ raw["w1"] + raw["b1"]
    h = h * jax.nn.sigmoid(h)
    r = jnp.maximum(h @ raw["w2"] + raw["b2"], 0.0)                        # (B, 1)
    return jnp.broadcast_to(r[:, None, :], (B, pred_len, 1))


if __name__ == "__main__":
    batch, seq_len, pred_len, d_model = 2, 8, 4, 64

    key = jax.random.PRNGKey(0)
    kp, kx = jax.random.split(key)
    raw = init_raw_params(kp, seq_len, d_model)
    kparams = fold_params(raw, seq_len, d_model)
    x = jax.random.normal(kx, (batch, seq_len, d_model), jnp.float32)

    out = jax.block_until_ready(radius_fc_pallas(kparams, x, pred_len))
    ref = jax.block_until_ready(radius_fc_reference(raw, x, pred_len))

    assert out.shape == (batch, pred_len, 1), out.shape
    np.testing.assert_allclose(np.asarray(out), np.asarray(ref), atol=5e-2, rtol=5e-2)
    print("KERNEL_OK")
</pallas_src>

<mosaic_0001>
module attributes {stable_mosaic.version = 11 : i64} {
  func.func @_radius_fc_kernel(%arg0: i32, %arg1: memref<8x512xbf16, #tpu.memory_space<vmem>>, %arg2: memref<512x64xbf16, #tpu.memory_space<vmem>>, %arg3: memref<1x64xf32, #tpu.memory_space<vmem>>, %arg4: memref<64x64xbf16, #tpu.memory_space<vmem>>, %arg5: memref<1x64xf32, #tpu.memory_space<vmem>>, %arg6: memref<64x128xbf16, #tpu.memory_space<vmem>>, %arg7: memref<1x128xf32, #tpu.memory_space<vmem>>, %arg8: memref<8x128xbf16, #tpu.memory_space<vmem>>) attributes {dimension_semantics = [#tpu.dimension_semantics<parallel>], iteration_bounds = array<i64: 1>, scalar_prefetch = 0 : i64, scratch_operands = 0 : i64, tpu.core_type = #tpu.core_type<tc>, window_params = [{transform_indices = @transform_0, window_bounds = array<i64: 8, 512>}, {pipeline_mode = #tpu.pipeline_mode<synchronous>, transform_indices = @transform_1, window_bounds = array<i64: 512, 64>}, {pipeline_mode = #tpu.pipeline_mode<synchronous>, transform_indices = @transform_2, window_bounds = array<i64: 1, 64>}, {pipeline_mode = #tpu.pipeline_mode<synchronous>, transform_indices = @transform_3, window_bounds = array<i64: 64, 64>}, {pipeline_mode = #tpu.pipeline_mode<synchronous>, transform_indices = @transform_4, window_bounds = array<i64: 1, 64>}, {pipeline_mode = #tpu.pipeline_mode<synchronous>, transform_indices = @transform_5, window_bounds = array<i64: 64, 128>}, {pipeline_mode = #tpu.pipeline_mode<synchronous>, transform_indices = @transform_6, window_bounds = array<i64: 1, 128>}, {transform_indices = @transform_7, window_bounds = array<i64: 8, 128>}]} {
    %c0 = arith.constant 0 : index
    %c0_0 = arith.constant 0 : index
    %0 = vector.load %arg1[%c0, %c0_0] : memref<8x512xbf16, #tpu.memory_space<vmem>>, vector<8x512xbf16>
    %c0_1 = arith.constant 0 : index
    %c0_2 = arith.constant 0 : index
    %1 = vector.load %arg2[%c0_1, %c0_2] : memref<512x64xbf16, #tpu.memory_space<vmem>>, vector<512x64xbf16>
    %cst = arith.constant dense<0.000000e+00> : vector<8x64xf32>
    %2 = tpu.matmul %0, %1, %cst {dimension_numbers = #tpu.dot_dimension_numbers<[1], [0], [0], [1], [0, 0, 1, 1], [], []>} : vector<8x512xbf16>, vector<512x64xbf16>, vector<8x64xf32> -> vector<8x64xf32>
    %c0_3 = arith.constant 0 : index
    %c0_4 = arith.constant 0 : index
    %3 = vector.load %arg3[%c0_3, %c0_4] : memref<1x64xf32, #tpu.memory_space<vmem>>, vector<1x64xf32>
    %4 = vector.broadcast %3 : vector<1x64xf32> to vector<8x64xf32>
    %5 = arith.addf %2, %4 : vector<8x64xf32>
    %6 = arith.negf %5 : vector<8x64xf32>
    %7 = math.exp %6 : vector<8x64xf32>
    %cst_5 = arith.constant 1.000000e+00 : f32
    %8 = vector.broadcast %cst_5 : f32 to vector<8x64xf32>
    %9 = arith.addf %8, %7 : vector<8x64xf32>
    %10 = arith.divf %8, %9 : vector<8x64xf32>
    %11 = arith.mulf %5, %10 : vector<8x64xf32>
    %12 = arith.truncf %11 : vector<8x64xf32> to vector<8x64xbf16>
    %c0_6 = arith.constant 0 : index
    %c0_7 = arith.constant 0 : index
    %13 = vector.load %arg4[%c0_6, %c0_7] : memref<64x64xbf16, #tpu.memory_space<vmem>>, vector<64x64xbf16>
    %cst_8 = arith.constant dense<0.000000e+00> : vector<8x64xf32>
    %14 = tpu.matmul %12, %13, %cst_8 {dimension_numbers = #tpu.dot_dimension_numbers<[1], [0], [0], [1], [0, 0, 1, 1], [], []>} : vector<8x64xbf16>, vector<64x64xbf16>, vector<8x64xf32> -> vector<8x64xf32>
    %c0_9 = arith.constant 0 : index
    %c0_10 = arith.constant 0 : index
    %15 = vector.load %arg5[%c0_9, %c0_10] : memref<1x64xf32, #tpu.memory_space<vmem>>, vector<1x64xf32>
    %16 = vector.broadcast %15 : vector<1x64xf32> to vector<8x64xf32>
    %17 = arith.addf %14, %16 : vector<8x64xf32>
    %18 = arith.negf %17 : vector<8x64xf32>
    %19 = math.exp %18 : vector<8x64xf32>
    %cst_11 = arith.constant 1.000000e+00 : f32
    %20 = vector.broadcast %cst_11 : f32 to vector<8x64xf32>
    %21 = arith.addf %20, %19 : vector<8x64xf32>
    %22 = arith.divf %20, %21 : vector<8x64xf32>
    %23 = arith.mulf %17, %22 : vector<8x64xf32>
    %24 = arith.truncf %23 : vector<8x64xf32> to vector<8x64xbf16>
    %c0_12 = arith.constant 0 : index
    %c0_13 = arith.constant 0 : index
    %25 = vector.load %arg6[%c0_12, %c0_13] : memref<64x128xbf16, #tpu.memory_space<vmem>>, vector<64x128xbf16>
    %cst_14 = arith.constant dense<0.000000e+00> : vector<8x128xf32>
    %26 = tpu.matmul %24, %25, %cst_14 {dimension_numbers = #tpu.dot_dimension_numbers<[1], [0], [0], [1], [0, 0, 1, 1], [], []>} : vector<8x64xbf16>, vector<64x128xbf16>, vector<8x128xf32> -> vector<8x128xf32>
    %c0_15 = arith.constant 0 : index
    %c0_16 = arith.constant 0 : index
    %27 = vector.load %arg7[%c0_15, %c0_16] : memref<1x128xf32, #tpu.memory_space<vmem>>, vector<1x128xf32>
    %28 = vector.broadcast %27 : vector<1x128xf32> to vector<8x128xf32>
    %29 = arith.addf %26, %28 : vector<8x128xf32>
    %cst_17 = arith.constant 0.000000e+00 : f32
    %30 = vector.broadcast %cst_17 : f32 to vector<8x128xf32>
    %31 = arith.maximumf %29, %30 : vector<8x128xf32>
    %32 = arith.truncf %31 : vector<8x128xf32> to vector<8x128xbf16>
    %c0_18 = arith.constant 0 : index
    %c0_19 = arith.constant 0 : index
    %33 = vector.load %arg8[%c0_18, %c0_19] : memref<8x128xbf16, #tpu.memory_space<vmem>>, vector<8x128xbf16>
    tpu.vector_store %arg8[%c0_18, %c0_19], %32 {strides = array<i32>} : memref<8x128xbf16, #tpu.memory_space<vmem>>, vector<8x128xbf16>,
    return
  }
  func.func @transform_0(%arg0: i32) -> (i32, i32) {
    %c0_i32 = arith.constant 0 : i32
    %c0_i32_0 = arith.constant 0 : i32
    return %arg0, %c0_i32 : i32, i32
  }
  func.func @transform_1(%arg0: i32) -> (i32, i32) {
    %c0_i32 = arith.constant 0 : i32
    %c0_i32_0 = arith.constant 0 : i32
    %c0_i32_1 = arith.constant 0 : i32
    return %c0_i32, %c0_i32_0 : i32, i32
  }
  func.func @transform_2(%arg0: i32) -> (i32, i32) {
    %c0_i32 = arith.constant 0 : i32
    %c0_i32_0 = arith.constant 0 : i32
    %c0_i32_1 = arith.constant 0 : i32
    return %c0_i32, %c0_i32_0 : i32, i32
  }
  func.func @transform_3(%arg0: i32) -> (i32, i32) {
    %c0_i32 = arith.constant 0 : i32
    %c0_i32_0 = arith.constant 0 : i32
    %c0_i32_1 = arith.constant 0 : i32
    return %c0_i32, %c0_i32_0 : i32, i32
  }
  func.func @transform_4(%arg0: i32) -> (i32, i32) {
    %c0_i32 = arith.constant 0 : i32
    %c0_i32_0 = arith.constant 0 : i32
    %c0_i32_1 = arith.constant 0 : i32
    return %c0_i32, %c0_i32_0 : i32, i32
  }
  func.func @transform_5(%arg0: i32) -> (i32, i32) {
    %c0_i32 = arith.constant 0 : i32
    %c0_i32_0 = arith.constant 0 : i32
    %c0_i32_1 = arith.constant 0 : i32
    return %c0_i32, %c0_i32_0 : i32, i32
  }
  func.func @transform_6(%arg0: i32) -> (i32, i32) {
    %c0_i32 = arith.constant 0 : i32
    %c0_i32_0 = arith.constant 0 : i32
    %c0_i32_1 = arith.constant 0 : i32
    return %c0_i32, %c0_i32_0 : i32, i32
  }
  func.func @transform_7(%arg0: i32) -> (i32, i32) {
    %c0_i32 = arith.constant 0 : i32
    %c0_i32_0 = arith.constant 0 : i32
    return %arg0, %c0_i32 : i32, i32
  }
}

</mosaic_0001>

<bundles_post_ra>
// kernel: tpu_custom_call.1
= control target key start
LH: loop header
LB: loop body
LE: loop exit
PB: predicated region body
PF: predicated region fallthrough
CT: control target
= control target key end

     0   :  { %12 = vsyncpa [#allocation3], 0  ;;  %v112_v30 = vlaneseq  ;;  %v858_v36 = vmov 1966171168   ;;  %v859_v47 = vmov 0.0   ;;  %vm860_vm0 = vmmov 0   ;;  %s1060_s0 = inlined_call_operand.vmem [shape: bf16[2,512], index: 0, kind: input, shape index: {}]   ;;  %s1061_s1 = inlined_call_operand.vmem [shape: bf16[512,64], index: 1, kind: input, shape index: {}]   ;;  %s1062_s2 = inlined_call_operand.vmem [shape: f32[1,64], index: 2, kind: input, shape index: {}]   ;;  %s1063_s3 = inlined_call_operand.vmem [shape: bf16[64,64], index: 3, kind: input, shape index: {}]   ;;  %s1064_s4 = inlined_call_operand.vmem [shape: f32[1,64], index: 4, kind: input, shape index: {}]   ;;  %s1065_s5 = inlined_call_operand.vmem [shape: bf16[64,128], index: 5, kind: input, shape index: {}]   ;;  %s1066_s6 = inlined_call_operand.vmem [shape: f32[1,128], index: 6, kind: input, shape index: {}]   ;;  %s1067_s7 = inlined_call_operand.hbm [shape: bf16[2,128], index: 7, kind: output, shape index: {}]  }
   0x1   :  { %v782_v0 = vld [vmem:[%s1061_s1 + $0x40] sm:$0xff]   ;;  %v786_v4 = vld [vmem:[%s1061_s1 + $0x48] sm:$0xff]   ;;  %v790_v8 = vld [vmem:[%s1061_s1 + $0x50] sm:$0xff]   ;;  %v110_v37 = vunpack.c.l.s4 %v858_v36  ;;  %vm464_vm1 = vcmask 523264  }
   0x2   :  { %v783_v1 = vld [vmem:[%s1061_s1 + $0xc0] sm:$0xff]   ;;  %698 = vmatprep.subr.bf16.mxu0 %v782_v0  ;;  %v787_v5 = vld [vmem:[%s1061_s1 + $0xc8] sm:$0xff]   ;;  %v791_v9 = vld [vmem:[%s1061_s1 + $0xd0] sm:$0xff]   ;;  %v113_v33 = vshrl.u32 %v112_v30, 7 }
   0x3   :  { %v784_v2 = vld [vmem:[%s1061_s1] sm:$0xff]   ;;  %720 = vmatprep.subr.bf16.mxu1 %v783_v1  ;;  %v788_v6 = vld [vmem:[%s1061_s1 + $0x8] sm:$0xff]   ;;  %v792_v10 = vld [vmem:[%s1061_s1 + $0x10] sm:$0xff]   ;;  %v111_v38 = vunpack.c.0.s8 %v110_v37 }
   0x4   :  { %v785_v3 = vld [vmem:[%s1061_s1 + $0x80] sm:$0xff]   ;;  %699 = vmatpush3.bf16.msra.mxu0 %v784_v2  ;;  %v789_v7 = vld [vmem:[%s1061_s1 + $0x88] sm:$0xff]   ;;  %v793_v11 = vld [vmem:[%s1061_s1 + $0x90] sm:$0xff]  }
   0x5   :  { %721 = vmatpush3.bf16.msra.mxu1 %v785_v3  ;;  %700 = vmatprep.subr.bf16.mxu0 %v786_v4  ;;  %v794_v12 = vld [vmem:[%s1061_s1 + $0x58] sm:$0xff]   ;;  %v798_v16 = vld [vmem:[%s1061_s1 + $0x60] sm:$0xff]   ;;  %v802_v20 = vld [vmem:[%s1061_s1 + $0x68] sm:$0xff]   ;;  %v1006_v39 = vsub.s32 %v111_v38, %v113_v33 }
   0x6   :  { %722 = vmatprep.subr.bf16.mxu1 %v787_v5  ;;  %v795_v13 = vld [vmem:[%s1061_s1 + $0xd8] sm:$0xff]   ;;  %v799_v17 = vld [vmem:[%s1061_s1 + $0xe0] sm:$0xff]   ;;  %v803_v21 = vld [vmem:[%s1061_s1 + $0xe8] sm:$0xff]  }
   0x7   :  { %v796_v14 = vld [vmem:[%s1061_s1 + $0x18] sm:$0xff]   ;;  %v800_v18 = vld [vmem:[%s1061_s1 + $0x20] sm:$0xff]   ;;  %v804_v22 = vld [vmem:[%s1061_s1 + $0x28] sm:$0xff]  }
   0x8   :  { %701 = vmatpush3.bf16.msra.mxu0 %v788_v6  ;;  %v797_v15 = vld [vmem:[%s1061_s1 + $0x98] sm:$0xff]   ;;  %v801_v19 = vld [vmem:[%s1061_s1 + $0xa0] sm:$0xff]   ;;  %v805_v23 = vld [vmem:[%s1061_s1 + $0xa8] sm:$0xff]  }
   0x9   :  { %723 = vmatpush3.bf16.msra.mxu1 %v789_v7  ;;  %702 = vmatprep.subr.bf16.mxu0 %v790_v8  ;;  %v806_v24 = vld [vmem:[%s1061_s1 + $0x70] sm:$0xff]   ;;  %v810_v28 = vld [vmem:[%s1061_s1 + $0x78] sm:$0xff]   ;;  %v832_v34 = vld.sshfl [vmem:[%s1060_s0] sm:$0xff pattern:$0x75316420] }
   0xa   :  { %724 = vmatprep.subr.bf16.mxu1 %v791_v9  ;;  %v807_v25 = vld [vmem:[%s1061_s1 + $0xf0] sm:$0xff]   ;;  %v811_v29 = vld [vmem:[%s1061_s1 + $0xf8] sm:$0xff]   ;;  %v833_v35 = vld.sshfl [vmem:[%s1060_s0 + $0x8] sm:$0xff pattern:$0x75316420] }
   0xb   :  { %v808_v26 = vld [vmem:[%s1061_s1 + $0x30] sm:$0xff]   ;;  %v812_v31 = vld [vmem:[%s1061_s1 + $0x38] sm:$0xff]   ;;  %v124_v40 = vcombine.high %v832_v34, %v833_v35  ;;  %v123_v41 = vcombine.low %v832_v34, %v833_v35  ;;  %v816_v46 = vld [vmem:[%s1063_s3] sm:$0xff]  }
   0xc   :  { %703 = vmatpush3.bf16.msra.mxu0 %v792_v10  ;;  %v809_v27 = vld [vmem:[%s1061_s1 + $0xb0] sm:$0xff]   ;;  %v813_v32 = vld [vmem:[%s1061_s1 + $0xb8] sm:$0xff]   ;;  %v817_v48 = vld [vmem:[%s1063_s3 + $0x8] sm:$0xff]  }
   0xd   :  { %725 = vmatpush3.bf16.msra.mxu1 %v793_v11  ;;  %704 = vmatprep.subr.bf16.mxu0 %v794_v12  ;;  %v138_v42 = vrot.slane %v124_v40, %v1006_v39  ;;  %v131_v43 = vrot.slane %v123_v41, %v1006_v39  ;;  %v818_v49 = vld [vmem:[%s1063_s3 + $0x10] sm:$0xff]   ;;  %v819_v50 = vld [vmem:[%s1063_s3 + $0x18] sm:$0xff]   ;;  %v649_v52 = vld [vmem:[%s1062_s2] ss:$0 sm:$0xff] }
   0xe   :  { %726 = vmatprep.subr.bf16.mxu1 %v795_v13  ;;  %v820_v6 = vld [vmem:[%s1065_s5] sm:$0xff]   ;;  %v821_v7 = vld [vmem:[%s1065_s5 + $0x8] sm:$0xff]   ;;  %v822_v8 = vld [vmem:[%s1065_s5 + $0x10] sm:$0xff]  }
   0xf   :  { %369 = vmatprep.mubr.bf16.mxu0 %v138_v42  ;;  %v140_v44 = vcombine.high %v138_v42, %v138_v42  ;;  %v139_v45 = vcombine.high %v131_v43, %v131_v43  ;;  %v823_v9 = vld [vmem:[%s1065_s5 + $0x18] sm:$0xff]   ;;  %v683_v10 = vld [vmem:[%s1064_s4] ss:$0 sm:$0xff] }
  0x10   :  { %705 = vmatpush3.bf16.msra.mxu0 %v796_v14 }
  0x11   :  { %727 = vmatpush3.bf16.msra.mxu1 %v797_v15  ;;  %706 = vmatprep.subr.bf16.mxu0 %v798_v16 }
  0x12   :  { %728 = vmatprep.subr.bf16.mxu1 %v799_v17  ;;  %409 = vmatprep.mubr.bf16.mxu1 %v140_v44 }
  0x14   :  { %707 = vmatpush3.bf16.msra.mxu0 %v800_v18 }
  0x15   :  { %729 = vmatpush3.bf16.msra.mxu1 %v801_v19  ;;  %708 = vmatprep.subr.bf16.mxu0 %v802_v20 }
  0x16   :  { %730 = vmatprep.subr.bf16.mxu1 %v803_v21 }
  0x18   :  { %709 = vmatpush3.bf16.msra.mxu0 %v804_v22  ;;  %v690_v22 = vld [vmem:[%s1066_s6] ss:$0 sm:$0xff] }
  0x19   :  { %731 = vmatpush3.bf16.msra.mxu1 %v805_v23  ;;  %710 = vmatprep.subr.bf16.mxu0 %v806_v24 }
  0x1a   :  { %732 = vmatprep.subr.bf16.mxu1 %v807_v25 }
  0x1c   :  { %711 = vmatpush3.bf16.msra.mxu0 %v808_v26 }
  0x1d   :  { %733 = vmatpush3.bf16.msra.mxu1 %v809_v27  ;;  %712 = vmatprep.subr.bf16.mxu0 %v810_v28 }
  0x1e   :  { %734 = vmatprep.subr.bf16.mxu1 %v811_v29 }
  0x20   :  { %713 = vmatpush3.bf16.msra.mxu0 %v812_v31 }
  0x21   :  { %735 = vmatpush3.bf16.msra.mxu1 %v813_v32  ;;  %752 = vmatprep.subr.bf16.mxu0 %v859_v47 }
  0x22   :  { %764 = vmatprep.subr.bf16.mxu1 %v859_v47 }
  0x23   :  { %370 = vmatmul.mubr.bf16.vlgmr.msra.gmra.mrb[0].mxu0 %v131_v43 }
  0x24   :  { %410 = vmatmul.mubr.bf16.vlgmr.msra.gmra.mrb[0].mxu1 %v139_v45  ;;  %753 = vmatpush3.bf16.msra.mxu0 %v816_v46 }
  0x25   :  { %754 = vmatprep.subr.bf16.mxu0 %v859_v47  ;;  %760 = vmatprep.mubr.msk.bf16.mxu0 %vm860_vm0, %v859_v47 }
  0x26   :  { %772 = vmatprep.mubr.msk.bf16.mxu1 %vm860_vm0, %v859_v47  ;;  %765 = vmatpush3.bf16.msra.mxu1 %v820_v6 }
  0x27   :  { %766 = vmatprep.subr.bf16.mxu1 %v859_v47 }
  0x28   :  { %755 = vmatpush3.bf16.msra.mxu0 %v817_v48 }
  0x29   :  { %756 = vmatprep.subr.bf16.mxu0 %v859_v47 }
  0x2a   :  { %767 = vmatpush3.bf16.msra.mxu1 %v821_v7 }
  0x2b   :  { %768 = vmatprep.subr.bf16.mxu1 %v859_v47 }
  0x2c   :  { %757 = vmatpush3.bf16.msra.mxu0 %v818_v49 }
  0x2d   :  { %758 = vmatprep.subr.bf16.mxu0 %v859_v47 }
  0x2e   :  { %769 = vmatpush3.bf16.msra.mxu1 %v822_v8 }
  0x2f   :  { %770 = vmatprep.subr.bf16.mxu1 %v859_v47 }
  0x30   :  { %759 = vmatpush3.bf16.msra.mxu0 %v819_v50 }
  0x32   :  { %771 = vmatpush3.bf16.msra.mxu1 %v823_v9 }
  0xf6   :  { %v714_v51 = vpop.f32.mrb[0].mxu0 }
  0xf7   :  { %v715_v53 = vpop.f32.mrb[1].mxu0  ;;  %v736_v54 = vpop.f32.mrb[0].mxu1 }
  0xf8   :  { %v716_v55 = vadd.f32 %v715_v53, %v714_v51  ;;  %v717_v56 = vpop.f32.mrb[2].mxu0  ;;  %v737_v57 = vpop.f32.mrb[1].mxu1 }
  0xf9   :  { %v718_v58 = vpop.f32.mrb[3].mxu0  ;;  %v738_v60 = vadd.f32 %v737_v57, %v736_v54  ;;  %v739_v61 = vpop.f32.mrb[2].mxu1 }
  0xfa   :  { %v372_v59 = vadd.f32 %v716_v55, %v649_v52  ;;  %v740_v62 = vpop.f32.mrb[3].mxu1 }
  0xfc   :  { %v412_v63 = vadd.f32 %v738_v60, %v372_v59 }
  0xfe   :  { %v682_v0 = vmul.f32 -1.442695, %v412_v63 }
 0x100   :  { %824 = vpow2.f32 %v682_v0 }
 0x10a   :  { %v825_v1 = vpop.eup %824 }
 0x10b   :  { %v420_v2 = vadd.f32 1.0, %v825_v1 }
 0x10d   :  { %826 = vrcp.f32 %v420_v2 }
 0x117   :  { %v827_v3 = vpop.eup %826 }
 0x118   :  { %v423_v4 = vmul.f32 %v827_v3, %v412_v63 }
 0x11a   :  { %v424_v5 = vpack.c.bf16 %v423_v4, %v423_v4 }
 0x11c   :  { %761 = vmatmul.mubr.msk.bf16.vlgmr.msra.gmra.mrb[4].mxu0 %vm464_vm1, %v424_v5 }
 0x1ef   :  { %v502_v11 = vpop.f32.mrb[4].mxu0 }
 0x1f0   :  { %v503_v12 = vadd.f32 %v683_v10, %v502_v11  ;;  %v762_v13 = vpop.f32.mrb[5].mxu0 }
 0x1f1   :  { %v505_v14 = vpop.f32.mrb[6].mxu0 }
 0x1f2   :  { %v689_v15 = vmul.f32 -1.442695, %v503_v12  ;;  %v763_v16 = vpop.f32.mrb[7].mxu0 }
 0x1f4   :  { %828 = vpow2.f32 %v689_v15 }
 0x1fe   :  { %v829_v17 = vpop.eup %828 }
 0x1ff   :  { %v511_v18 = vadd.f32 1.0, %v829_v17 }
 0x201   :  { %830 = vrcp.f32 %v511_v18 }
 0x20b   :  { %v831_v19 = vpop.eup %830 }
 0x20c   :  { %v514_v20 = vmul.f32 %v831_v19, %v503_v12 }
 0x20e   :  { %v515_v21 = vpack.c.bf16 %v514_v20, %v514_v20 }
 0x210   :  { %773 = vmatmul.mubr.msk.bf16.vlgmr.msra.gmra.mrb[4].mxu1 %vm464_vm1, %v515_v21 }
 0x2e3   :  { %v592_v23 = vpop.f32.mrb[4].mxu1 }
 0x2e4   :  { %v593_v24 = vadd.f32 %v690_v22, %v592_v23  ;;  %v774_v25 = vpop.f32.mrb[5].mxu1 }
 0x2e5   :  { %v595_v26 = vpop.f32.mrb[6].mxu1 }
 0x2e6   :  { %v598_v27 = vmax.f32 %v593_v24, 0.0  ;;  %v775_v28 = vpop.f32.mrb[7].mxu1 }
 0x2e8   :  { %v599_v29 = vpack.c.bf16 %v598_v27, %v598_v27 }
 0x2ea   :  { %v607_v30 = vrot.slane %v599_v29, %v1006_v39 }
 0x2ec   :  { %v608_v31 = vcombine.high %v607_v30, %v607_v30  ;;  %v615_v32 = vrot.slane %v607_v30, %v1006_v39  ;;  %696 = vst.sshfl [vmem:[#allocation2] sm:$0x1 pattern:$0x73625140] %v607_v30 }
 0x2ee   :  { %v622_v33 = vrot.slane %v608_v31, %v1006_v39  ;;  %v623_v34 = vcombine.high %v615_v32, %v615_v32  ;;  %697 = vst.sshfl [vmem:[#allocation2 + $0x1] sm:$0x1 pattern:$0x73625140] %v608_v31 }
 0x2f0   :  { %v624_v35 = vcombine.high %v622_v33, %v622_v33  ;;  %631 = vst [vmem:[#allocation2 + $0x2] sm:$0x1] %v623_v34 }
 0x2f2   :  { %632 = vst [vmem:[#allocation2 + $0x3] sm:$0x1] %v624_v35 }
 0x2f3   :  { %637 = vsyncadd [#allocation3], 48  ;;  %s861_s4 = smov [#allocation2]  }
 0x2f4   :  { %s638_s6 = sshll.u32 %s861_s4, 4  ;;  %s639_s6 = int_to_ptr.vmem [resolvable:$true] %s638_s6 }
 0x2f5   :  { %s834_s17 = scalar_lea.vmem %s639_s6, 16  ;;  %s838_s18 = scalar_lea.vmem %s639_s6, 64 }
 0x2f6   :  { %p835_p0 = scmp.ne.s32.totalorder %s639_s6, %s834_s17  ;;  %p839_p1 = scmp.lt.s32.totalorder %s639_s6, %s639_s6 }
 0x2f7   :  { %p840_p2 = scmp.lt.s32.totalorder %s838_s18, %s834_s17 }
 0x2f9   :  { %p841_p3 = por %p840_p2, %p839_p1 }
 0x2fb   :  { %p842_p4 = pnand %p841_p3, %p835_p0 }
 0x2fd   :  { %845 = shalt.err (!%p842_p4)
}
 0x2fe   :  { %s846_s21 = scalar_lea.hbm %s1067_s7, 16 }
 0x2ff   :  { %p847_p5 = scmp.ne.s32.totalorder %s1067_s7, %s846_s21  ;;  %p850_p6 = scmp.lt.u32.totalorder %s846_s21, %s1067_s7 }
 0x301   :  { %p852_p7 = pnand %p850_p6, %p847_p5 }
 0x303   :  { %855 = shalt.err (!%p852_p7)
}
 0x304   :  { %s862_s24 = smov 16   ;;  %s863_s25 = smov 1  }
 0x305   :  { %644 = dma.vmem_to_hbm [thread:$0]  %s639_s6, 16, %s1067_s7, [#allocation3], %s862_s24, %s862_s24, %s863_s25  }
 0x306   :  { %856 = dma.done.wait [#allocation3], 64  }
 0x307   :  { %857 = vsyncadd [#allocation3], 4294967232 }
 0x308   :  { %648 = vsyncpa [#allocation3], 1 }

</bundles_post_ra>
